<compile_context>
chip_gen: v7x
topology: tpu7x:2x2x1
jax: 0.10.0
libtpu: 0.0.40
codegen_flags: <defaults>
</compile_context>

<pallas_src>
import functools
import math

import jax
import jax.numpy as jnp
from jax.experimental import pallas as pl
from jax.experimental.pallas import tpu as pltpu

LN_EPS = 1e-5          # PyTorch nn.LayerNorm default eps
LANE = 128             # TPU lane width
VMEM_LIMIT_BYTES = 48 * 1024 * 1024  # < v7x 64 MiB physical; plenty on v5e/v6e


def _round_up(x: int, m: int) -> int:
    return ((x + m - 1) // m) * m


def _pick_bm(batch: int, cap: int = 256) -> int:
    """Batch tile: multiple of 16 (bf16 sublane packing), capped, and when the
    batch is large enough prefer >=2 grid steps (v7x dual-TensorCore sharding)."""
    bm = min(_round_up(batch, 16), cap)
    if batch > 16 and _round_up(batch, bm) // bm < 2:
        bm = _round_up((batch + 1) // 2, 16)
    return bm


def _pick_bn(out_f_pad: int) -> int:
    """Largest lane-dense N tile (never below 128) that divides out_f_pad."""
    for cand in (512, 256, 128):
        if out_f_pad % cand == 0:
            return cand
    return out_f_pad  # unreachable: out_f_pad is always a multiple of 128


def _layernorm_f32(h, gamma_ref, beta_ref):
    """LayerNorm with f32 statistics (biased variance, like torch)."""
    mean = jnp.mean(h, axis=-1, keepdims=True)
    centered = h - mean
    var = jnp.mean(centered * centered, axis=-1, keepdims=True)
    xn = centered * jax.lax.rsqrt(var + LN_EPS)
    return xn * gamma_ref[...].astype(jnp.float32) + beta_ref[...].astype(jnp.float32)


def _ln_linear_relu(h, gamma_ref, beta_ref, w_ref, b_ref):
    """LayerNorm (f32 stats) -> Linear (bf16 MXU operands, f32 accum) -> ReLU."""
    xn = _layernorm_f32(h, gamma_ref, beta_ref)
    y = jnp.dot(xn.astype(jnp.bfloat16), w_ref[...],
                preferred_element_type=jnp.float32)
    y = y + b_ref[...].astype(jnp.float32)
    # ReLU; Dropout (eval mode) == identity.
    return jnp.maximum(y, 0.0)


# ---------------------------------------------------------------------------
# Fused encoder: all layers in ONE pallas_call, intermediates never touch HBM.
# ---------------------------------------------------------------------------
def _fused_encoder_kernel(n_layers, x_ref, *refs):
    o_ref = refs[-1]
    p_refs = refs[:-1]  # 4 refs per layer: gamma, beta, w(bf16), bias
    h = x_ref[...].astype(jnp.float32)
    for i in range(n_layers):
        gamma_ref, beta_ref, w_ref, b_ref = p_refs[4 * i:4 * i + 4]
        h = _ln_linear_relu(h, gamma_ref, beta_ref, w_ref, b_ref)
    o_ref[...] = h.astype(o_ref.dtype)  # lane-dense: out dim padded to 128 wrapper-side


def encoder_forward(x, params, *, block_m=None):
    """Full encoder (stack of LinearLayer) in a single Pallas kernel.

    x: (B, in_f0) f32.  params: list of (gamma f32, beta f32, w bf16 (in,out), b f32).
    """
    B, in_f0 = x.shape
    n_layers = len(params)
    out_f_last = params[-1][2].shape[1]
    out_f_pad = _round_up(out_f_last, LANE)  # lane-dense final store

    bm = block_m if block_m is not None else _pick_bm(B)
    Bp = _round_up(B, bm)
    if Bp != B:
        # Ragged batch: pad with zeros (LN of a zero row is finite; padded rows
        # are sliced away below), no in-kernel masking needed.
        x = jnp.pad(x, ((0, Bp - B), (0, 0)))

    flat_args = [x]
    in_specs = [pl.BlockSpec((bm, in_f0), lambda i: (i, 0))]  # batch-tiled input
    for li, (gamma, beta, w, b) in enumerate(params):
        in_f, out_f = w.shape
        if li == n_layers - 1 and out_f_pad != out_f:
            # Pad the last layer's output dim with zero columns so the single
            # HBM store of the result is an unmasked full-lane store.
            w = jnp.pad(w, ((0, 0), (0, out_f_pad - out_f)))
            b = jnp.pad(b, ((0, out_f_pad - out_f),))
            out_f = out_f_pad
        flat_args += [gamma.reshape(1, in_f), beta.reshape(1, in_f),
                      w, b.reshape(1, out_f)]
        # Grid-invariant operands -> single-buffered (halves their VMEM footprint).
        in_specs += [
            pl.BlockSpec((1, in_f), lambda i: (0, 0), pipeline_mode=pl.Buffered(1)),
            pl.BlockSpec((1, in_f), lambda i: (0, 0), pipeline_mode=pl.Buffered(1)),
            pl.BlockSpec((in_f, out_f), lambda i: (0, 0), pipeline_mode=pl.Buffered(1)),
            pl.BlockSpec((1, out_f), lambda i: (0, 0), pipeline_mode=pl.Buffered(1)),
        ]

    out = pl.pallas_call(
        functools.partial(_fused_encoder_kernel, n_layers),
        out_shape=jax.ShapeDtypeStruct((Bp, out_f_pad), x.dtype),
        grid_spec=pltpu.PrefetchScalarGridSpec(
            num_scalar_prefetch=0,
            grid=(Bp // bm,),
            in_specs=in_specs,
            out_specs=pl.BlockSpec((bm, out_f_pad), lambda i: (i, 0)),
        ),
        compiler_params=pltpu.CompilerParams(
            dimension_semantics=("parallel",),      # batch tiles independent (megacore)
            vmem_limit_bytes=VMEM_LIMIT_BYTES,      # explicit, generation-safe budget
        ),
    )(*flat_args)

    return out[:B, :out_f_last]


# ---------------------------------------------------------------------------
# Single-layer path with M/N tiling (general fallback for layers too large to
# keep whole-weight-resident in the fused path).
# ---------------------------------------------------------------------------
def _linear_layer_kernel(x_ref, gamma_ref, beta_ref, w_ref, b_ref, o_ref, xn_ref):
    # LayerNorm + bf16 cast computed ONCE per M tile (at the first N tile) and
    # reused for all N tiles from VMEM scratch; no per-N-tile recompute.
    @pl.when(pl.program_id(1) == 0)
    def _():
        h = x_ref[...].astype(jnp.float32)
        xn_ref[...] = _layernorm_f32(h, gamma_ref, beta_ref).astype(jnp.bfloat16)

    y = jnp.dot(xn_ref[...], w_ref[...], preferred_element_type=jnp.float32)
    y = y + b_ref[...].astype(jnp.float32)
    o_ref[...] = jnp.maximum(y, 0.0).astype(o_ref.dtype)


def linear_layer(x, gamma, beta, w, b, *, block_m=None, block_n=None):
    """One LinearLayer forward via a Pallas kernel. x: (B, in_f) -> (B, out_f)."""
    B, in_f = x.shape
    out_f = w.shape[1]
    out_f_pad = _round_up(out_f, LANE)  # never store with < 128 lanes
    if out_f_pad != out_f:
        w = jnp.pad(w, ((0, 0), (0, out_f_pad - out_f)))
        b = jnp.pad(b, ((0, out_f_pad - out_f),))

    bm = block_m if block_m is not None else _pick_bm(B)
    bn = block_n if block_n is not None else _pick_bn(out_f_pad)
    assert out_f_pad % bn == 0 and bn % LANE == 0, "block_n must be lane-dense and divide padded out_f"

    Bp = _round_up(B, bm)
    if Bp != B:
        x = jnp.pad(x, ((0, Bp - B), (0, 0)))

    gamma2 = gamma.reshape(1, in_f)
    beta2 = beta.reshape(1, in_f)
    b2 = b.reshape(1, out_f_pad)

    out = pl.pallas_call(
        _linear_layer_kernel,
        out_shape=jax.ShapeDtypeStruct((Bp, out_f_pad), x.dtype),
        grid_spec=pltpu.PrefetchScalarGridSpec(
            num_scalar_prefetch=0,
            grid=(Bp // bm, out_f_pad // bn),
            in_specs=[
                pl.BlockSpec((bm, in_f), lambda i, j: (i, 0)),   # x tile (j-invariant)
                pl.BlockSpec((1, in_f), lambda i, j: (0, 0),
                             pipeline_mode=pl.Buffered(1)),       # gamma (invariant)
                pl.BlockSpec((1, in_f), lambda i, j: (0, 0),
                             pipeline_mode=pl.Buffered(1)),       # beta  (invariant)
                pl.BlockSpec((in_f, bn), lambda i, j: (0, j)),   # W N-tile (bf16)
                pl.BlockSpec((1, bn), lambda i, j: (0, j)),      # bias N-tile
            ],
            out_specs=pl.BlockSpec((bm, bn), lambda i, j: (i, j)),
            scratch_shapes=[pltpu.VMEM((bm, in_f), jnp.bfloat16)],  # normalized x, reused over N
        ),
        compiler_params=pltpu.CompilerParams(
            # N axis must be sequential (scratch reuse across N tiles); M stays parallel.
            dimension_semantics=("parallel", "arbitrary"),
            vmem_limit_bytes=VMEM_LIMIT_BYTES,
        ),
    )(x, gamma2, beta2, w, b2)

    return out[:B, :out_f]


# ---------------------------------------------------------------------------
# Parameter init / reference / demo
# ---------------------------------------------------------------------------
def init_encoder_params(layer_sizes, key):
    """Init mirroring nn.LayerNorm / nn.Linear shapes (W stored transposed, bf16)."""
    params = []
    for i in range(1, len(layer_sizes)):
        in_f, out_f = layer_sizes[i - 1], layer_sizes[i]
        key, kw, kb = jax.random.split(key, 3)
        gamma = jnp.ones((in_f,), jnp.float32)   # LayerNorm weight init
        beta = jnp.zeros((in_f,), jnp.float32)   # LayerNorm bias init
        bound = 1.0 / math.sqrt(in_f)
        w = jax.random.uniform(kw, (in_f, out_f), jnp.float32, -bound, bound
                               ).astype(jnp.bfloat16)
        b = jax.random.uniform(kb, (out_f,), jnp.float32, -bound, bound)
        params.append((gamma, beta, w, b))
    return params


def _reference_forward(x, params):
    """Pure-JAX reference mirroring the kernel math (bf16 matmul operands, f32 accum)."""
    for (gamma, beta, w, b) in params:
        mean = jnp.mean(x, axis=-1, keepdims=True)
        var = jnp.mean((x - mean) ** 2, axis=-1, keepdims=True)
        xn = (x - mean) / jnp.sqrt(var + LN_EPS)
        xn = xn * gamma + beta
        y = jnp.dot(xn.astype(jnp.bfloat16).astype(jnp.float32),
                    w.astype(jnp.float32)) + b
        x = jnp.maximum(y, 0.0)
    return x


if __name__ == "__main__":
    key = jax.random.PRNGKey(0)
    k_in, k_params = jax.random.split(key)

    layer_sizes = [64, 48, 32]
    batch = 8
    x = jax.random.normal(k_in, (batch, layer_sizes[0]), jnp.float32)
    params = init_encoder_params(layer_sizes, k_params)

    # Fused encoder: one pallas_call, intermediates never leave VMEM.
    out = jax.block_until_ready(jax.jit(encoder_forward)(x, params))
    ref = _reference_forward(x, params)
    assert out.shape == (batch, layer_sizes[-1]), out.shape
    assert jnp.allclose(out, ref, atol=1e-3, rtol=1e-3)

    # Single-layer M/N-tiled path (general fallback for large layers).
    g0, be0, w0, b0 = params[0]
    out1 = jax.block_until_ready(jax.jit(linear_layer)(x, g0, be0, w0, b0))
    ref1 = _reference_forward(x, params[:1])
    assert out1.shape == (batch, layer_sizes[1]), out1.shape
    assert jnp.allclose(out1, ref1, atol=1e-3, rtol=1e-3)

    print("KERNEL_OK")
</pallas_src>

<mosaic_0001>
module attributes {stable_mosaic.version = 11 : i64} {
  func.func @_fused_encoder_kernel(%arg0: i32, %arg1: memref<16x64xf32, #tpu.memory_space<vmem>>, %arg2: memref<1x64xf32, #tpu.memory_space<vmem>>, %arg3: memref<1x64xf32, #tpu.memory_space<vmem>>, %arg4: memref<64x48xbf16, #tpu.memory_space<vmem>>, %arg5: memref<1x48xf32, #tpu.memory_space<vmem>>, %arg6: memref<1x48xf32, #tpu.memory_space<vmem>>, %arg7: memref<1x48xf32, #tpu.memory_space<vmem>>, %arg8: memref<48x128xbf16, #tpu.memory_space<vmem>>, %arg9: memref<1x128xf32, #tpu.memory_space<vmem>>, %arg10: memref<16x128xf32, #tpu.memory_space<vmem>>) attributes {dimension_semantics = [#tpu.dimension_semantics<parallel>], iteration_bounds = array<i64: 1>, scalar_prefetch = 0 : i64, scratch_operands = 0 : i64, tpu.core_type = #tpu.core_type<tc>, window_params = [{transform_indices = @transform_0, window_bounds = array<i64: 16, 64>}, {pipeline_mode = #tpu.pipeline_mode<synchronous>, transform_indices = @transform_1, window_bounds = array<i64: 1, 64>}, {pipeline_mode = #tpu.pipeline_mode<synchronous>, transform_indices = @transform_2, window_bounds = array<i64: 1, 64>}, {pipeline_mode = #tpu.pipeline_mode<synchronous>, transform_indices = @transform_3, window_bounds = array<i64: 64, 48>}, {pipeline_mode = #tpu.pipeline_mode<synchronous>, transform_indices = @transform_4, window_bounds = array<i64: 1, 48>}, {pipeline_mode = #tpu.pipeline_mode<synchronous>, transform_indices = @transform_5, window_bounds = array<i64: 1, 48>}, {pipeline_mode = #tpu.pipeline_mode<synchronous>, transform_indices = @transform_6, window_bounds = array<i64: 1, 48>}, {pipeline_mode = #tpu.pipeline_mode<synchronous>, transform_indices = @transform_7, window_bounds = array<i64: 48, 128>}, {pipeline_mode = #tpu.pipeline_mode<synchronous>, transform_indices = @transform_8, window_bounds = array<i64: 1, 128>}, {transform_indices = @transform_9, window_bounds = array<i64: 16, 128>}]} {
    %c0 = arith.constant 0 : index
    %c0_0 = arith.constant 0 : index
    %0 = vector.load %arg1[%c0, %c0_0] : memref<16x64xf32, #tpu.memory_space<vmem>>, vector<16x64xf32>
    %cst = arith.constant dense<0.000000e+00> : vector<16xf32>
    %1 = vector.multi_reduction <add>, %0, %cst [1] : vector<16x64xf32> to vector<16xf32>
    %2 = vector.shape_cast %1 : vector<16xf32> to vector<16x1xf32>
    %cst_1 = arith.constant 6.400000e+01 : f32
    %3 = vector.broadcast %cst_1 : f32 to vector<16x1xf32>
    %4 = arith.divf %2, %3 : vector<16x1xf32>
    %5 = vector.broadcast %4 : vector<16x1xf32> to vector<16x64xf32>
    %6 = arith.subf %0, %5 : vector<16x64xf32>
    %7 = arith.mulf %6, %6 : vector<16x64xf32>
    %cst_2 = arith.constant dense<0.000000e+00> : vector<16xf32>
    %8 = vector.multi_reduction <add>, %7, %cst_2 [1] : vector<16x64xf32> to vector<16xf32>
    %9 = vector.shape_cast %8 : vector<16xf32> to vector<16x1xf32>
    %cst_3 = arith.constant 6.400000e+01 : f32
    %10 = vector.broadcast %cst_3 : f32 to vector<16x1xf32>
    %11 = arith.divf %9, %10 : vector<16x1xf32>
    %cst_4 = arith.constant 9.99999974E-6 : f32
    %12 = vector.broadcast %cst_4 : f32 to vector<16x1xf32>
    %13 = arith.addf %11, %12 : vector<16x1xf32>
    %14 = math.rsqrt %13 : vector<16x1xf32>
    %15 = vector.broadcast %14 : vector<16x1xf32> to vector<16x64xf32>
    %16 = arith.mulf %6, %15 : vector<16x64xf32>
    %c0_5 = arith.constant 0 : index
    %c0_6 = arith.constant 0 : index
    %17 = vector.load %arg2[%c0_5, %c0_6] : memref<1x64xf32, #tpu.memory_space<vmem>>, vector<1x64xf32>
    %18 = vector.broadcast %17 : vector<1x64xf32> to vector<16x64xf32>
    %19 = arith.mulf %16, %18 : vector<16x64xf32>
    %c0_7 = arith.constant 0 : index
    %c0_8 = arith.constant 0 : index
    %20 = vector.load %arg3[%c0_7, %c0_8] : memref<1x64xf32, #tpu.memory_space<vmem>>, vector<1x64xf32>
    %21 = vector.broadcast %20 : vector<1x64xf32> to vector<16x64xf32>
    %22 = arith.addf %19, %21 : vector<16x64xf32>
    %23 = arith.truncf %22 : vector<16x64xf32> to vector<16x64xbf16>
    %c0_9 = arith.constant 0 : index
    %c0_10 = arith.constant 0 : index
    %24 = vector.load %arg4[%c0_9, %c0_10] : memref<64x48xbf16, #tpu.memory_space<vmem>>, vector<64x48xbf16>
    %cst_11 = arith.constant dense<0.000000e+00> : vector<16x48xf32>
    %25 = tpu.matmul %23, %24, %cst_11 {dimension_numbers = #tpu.dot_dimension_numbers<[1], [0], [0], [1], [0, 0, 1, 1], [], []>} : vector<16x64xbf16>, vector<64x48xbf16>, vector<16x48xf32> -> vector<16x48xf32>
    %c0_12 = arith.constant 0 : index
    %c0_13 = arith.constant 0 : index
    %26 = vector.load %arg5[%c0_12, %c0_13] : memref<1x48xf32, #tpu.memory_space<vmem>>, vector<1x48xf32>
    %27 = vector.broadcast %26 : vector<1x48xf32> to vector<16x48xf32>
    %28 = arith.addf %25, %27 : vector<16x48xf32>
    %cst_14 = arith.constant 0.000000e+00 : f32
    %29 = vector.broadcast %cst_14 : f32 to vector<16x48xf32>
    %30 = arith.maximumf %28, %29 : vector<16x48xf32>
    %cst_15 = arith.constant dense<0.000000e+00> : vector<16xf32>
    %31 = vector.multi_reduction <add>, %30, %cst_15 [1] : vector<16x48xf32> to vector<16xf32>
    %32 = vector.shape_cast %31 : vector<16xf32> to vector<16x1xf32>
    %cst_16 = arith.constant 4.800000e+01 : f32
    %33 = vector.broadcast %cst_16 : f32 to vector<16x1xf32>
    %34 = arith.divf %32, %33 : vector<16x1xf32>
    %35 = vector.broadcast %34 : vector<16x1xf32> to vector<16x48xf32>
    %36 = arith.subf %30, %35 : vector<16x48xf32>
    %37 = arith.mulf %36, %36 : vector<16x48xf32>
    %cst_17 = arith.constant dense<0.000000e+00> : vector<16xf32>
    %38 = vector.multi_reduction <add>, %37, %cst_17 [1] : vector<16x48xf32> to vector<16xf32>
    %39 = vector.shape_cast %38 : vector<16xf32> to vector<16x1xf32>
    %cst_18 = arith.constant 4.800000e+01 : f32
    %40 = vector.broadcast %cst_18 : f32 to vector<16x1xf32>
    %41 = arith.divf %39, %40 : vector<16x1xf32>
    %cst_19 = arith.constant 9.99999974E-6 : f32
    %42 = vector.broadcast %cst_19 : f32 to vector<16x1xf32>
    %43 = arith.addf %41, %42 : vector<16x1xf32>
    %44 = math.rsqrt %43 : vector<16x1xf32>
    %45 = vector.broadcast %44 : vector<16x1xf32> to vector<16x48xf32>
    %46 = arith.mulf %36, %45 : vector<16x48xf32>
    %c0_20 = arith.constant 0 : index
    %c0_21 = arith.constant 0 : index
    %47 = vector.load %arg6[%c0_20, %c0_21] : memref<1x48xf32, #tpu.memory_space<vmem>>, vector<1x48xf32>
    %48 = vector.broadcast %47 : vector<1x48xf32> to vector<16x48xf32>
    %49 = arith.mulf %46, %48 : vector<16x48xf32>
    %c0_22 = arith.constant 0 : index
    %c0_23 = arith.constant 0 : index
    %50 = vector.load %arg7[%c0_22, %c0_23] : memref<1x48xf32, #tpu.memory_space<vmem>>, vector<1x48xf32>
    %51 = vector.broadcast %50 : vector<1x48xf32> to vector<16x48xf32>
    %52 = arith.addf %49, %51 : vector<16x48xf32>
    %53 = arith.truncf %52 : vector<16x48xf32> to vector<16x48xbf16>
    %c0_24 = arith.constant 0 : index
    %c0_25 = arith.constant 0 : index
    %54 = vector.load %arg8[%c0_24, %c0_25] : memref<48x128xbf16, #tpu.memory_space<vmem>>, vector<48x128xbf16>
    %cst_26 = arith.constant dense<0.000000e+00> : vector<16x128xf32>
    %55 = tpu.matmul %53, %54, %cst_26 {dimension_numbers = #tpu.dot_dimension_numbers<[1], [0], [0], [1], [0, 0, 1, 1], [], []>} : vector<16x48xbf16>, vector<48x128xbf16>, vector<16x128xf32> -> vector<16x128xf32>
    %c0_27 = arith.constant 0 : index
    %c0_28 = arith.constant 0 : index
    %56 = vector.load %arg9[%c0_27, %c0_28] : memref<1x128xf32, #tpu.memory_space<vmem>>, vector<1x128xf32>
    %57 = vector.broadcast %56 : vector<1x128xf32> to vector<16x128xf32>
    %58 = arith.addf %55, %57 : vector<16x128xf32>
    %cst_29 = arith.constant 0.000000e+00 : f32
    %59 = vector.broadcast %cst_29 : f32 to vector<16x128xf32>
    %60 = arith.maximumf %58, %59 : vector<16x128xf32>
    %c0_30 = arith.constant 0 : index
    %c0_31 = arith.constant 0 : index
    %61 = vector.load %arg10[%c0_30, %c0_31] : memref<16x128xf32, #tpu.memory_space<vmem>>, vector<16x128xf32>
    tpu.vector_store %arg10[%c0_30, %c0_31], %60 {strides = array<i32>} : memref<16x128xf32, #tpu.memory_space<vmem>>, vector<16x128xf32>,
    return
  }
  func.func @transform_0(%arg0: i32) -> (i32, i32) {
    %c0_i32 = arith.constant 0 : i32
    %c0_i32_0 = arith.constant 0 : i32
    return %arg0, %c0_i32 : i32, i32
  }
  func.func @transform_1(%arg0: i32) -> (i32, i32) {
    %c0_i32 = arith.constant 0 : i32
    %c0_i32_0 = arith.constant 0 : i32
    %c0_i32_1 = arith.constant 0 : i32
    return %c0_i32, %c0_i32_0 : i32, i32
  }
  func.func @transform_2(%arg0: i32) -> (i32, i32) {
    %c0_i32 = arith.constant 0 : i32
    %c0_i32_0 = arith.constant 0 : i32
    %c0_i32_1 = arith.constant 0 : i32
    return %c0_i32, %c0_i32_0 : i32, i32
  }
  func.func @transform_3(%arg0: i32) -> (i32, i32) {
    %c0_i32 = arith.constant 0 : i32
    %c0_i32_0 = arith.constant 0 : i32
    %c0_i32_1 = arith.constant 0 : i32
    return %c0_i32, %c0_i32_0 : i32, i32
  }
  func.func @transform_4(%arg0: i32) -> (i32, i32) {
    %c0_i32 = arith.constant 0 : i32
    %c0_i32_0 = arith.constant 0 : i32
    %c0_i32_1 = arith.constant 0 : i32
    return %c0_i32, %c0_i32_0 : i32, i32
  }
  func.func @transform_5(%arg0: i32) -> (i32, i32) {
    %c0_i32 = arith.constant 0 : i32
    %c0_i32_0 = arith.constant 0 : i32
    %c0_i32_1 = arith.constant 0 : i32
    return %c0_i32, %c0_i32_0 : i32, i32
  }
  func.func @transform_6(%arg0: i32) -> (i32, i32) {
    %c0_i32 = arith.constant 0 : i32
    %c0_i32_0 = arith.constant 0 : i32
    %c0_i32_1 = arith.constant 0 : i32
    return %c0_i32, %c0_i32_0 : i32, i32
  }
  func.func @transform_7(%arg0: i32) -> (i32, i32) {
    %c0_i32 = arith.constant 0 : i32
    %c0_i32_0 = arith.constant 0 : i32
    %c0_i32_1 = arith.constant 0 : i32
    return %c0_i32, %c0_i32_0 : i32, i32
  }
  func.func @transform_8(%arg0: i32) -> (i32, i32) {
    %c0_i32 = arith.constant 0 : i32
    %c0_i32_0 = arith.constant 0 : i32
    %c0_i32_1 = arith.constant 0 : i32
    return %c0_i32, %c0_i32_0 : i32, i32
  }
  func.func @transform_9(%arg0: i32) -> (i32, i32) {
    %c0_i32 = arith.constant 0 : i32
    %c0_i32_0 = arith.constant 0 : i32
    return %arg0, %c0_i32 : i32, i32
  }
}

</mosaic_0001>

<bundles_post_ra>
// kernel: encoder_forward.1
= control target key start
LH: loop header
LB: loop body
LE: loop exit
PB: predicated region body
PF: predicated region fallthrough
CT: control target
= control target key end

     0   :  { %vm35_vm0 = vcmask 523264   ;;  %v360_v15 = vmov 0.0   ;;  %vm361_vm1 = vmmov 0   ;;  %vm167_vm2 = vcmask 392192   ;;  %s482_s0 = inlined_call_operand.vmem [shape: f32[16,64], index: 0, kind: input, shape index: {}]   ;;  %s483_s3 = inlined_call_operand.vmem [shape: bf16[64,48], index: 3, kind: input, shape index: {}]   ;;  %s484_s1 = inlined_call_operand.vmem [shape: f32[1,64], index: 1, kind: input, shape index: {}]   ;;  %s485_s2 = inlined_call_operand.vmem [shape: f32[1,64], index: 2, kind: input, shape index: {}]   ;;  %s486_s4 = inlined_call_operand.vmem [shape: f32[1,48], index: 4, kind: input, shape index: {}]   ;;  %s487_s7 = inlined_call_operand.vmem [shape: bf16[48,128], index: 7, kind: input, shape index: {}]   ;;  %s488_s5 = inlined_call_operand.vmem [shape: f32[1,48], index: 5, kind: input, shape index: {}]   ;;  %s489_s6 = inlined_call_operand.vmem [shape: f32[1,48], index: 6, kind: input, shape index: {}]   ;;  %s490_s8 = inlined_call_operand.vmem [shape: f32[1,128], index: 8, kind: input, shape index: {}]   ;;  %s491_s9 = inlined_call_operand.vmem [shape: f32[16,128], index: 9, kind: output, shape index: {}]  }
   0x1   :  { %v33_v0 = vld [vmem:[%s482_s0] sm:$0xff]  ;;  %v34_v1 = vld [vmem:[%s482_s0 + $0x8] sm:$0xff]  ;;  %321 = vmatprep.subr.bf16.mxu0 %v360_v15  ;;  %333 = vmatprep.subr.bf16.mxu1 %v360_v15  ;;  %v347_v17 = vld [vmem:[%s483_s3 + $0x10] sm:$0xff]  }
   0x2   :  { %v36_v2 = vsel %vm35_vm0, %v33_v0, 0.0  ;;  %v39_v3 = vsel %vm35_vm0, %v34_v1, 0.0  ;;  %v345_v14 = vld [vmem:[%s483_s3] sm:$0xff]   ;;  %v346_v16 = vld [vmem:[%s483_s3 + $0x8] sm:$0xff]   ;;  %v348_v18 = vld [vmem:[%s483_s3 + $0x18] sm:$0xff]   ;;  %329 = vmatprep.mubr.msk.bf16.mxu0 %vm361_vm1, %v360_v15  ;;  %339 = vmatprep.mubr.msk.bf16.mxu1 %vm361_vm1, %v360_v15 }
   0x3   :  { %37 = vadd.xlane.f32.xlu0 %v36_v2  ;;  %322 = vmatpush3.bf16.msra.mxu0 %v345_v14  ;;  %v297_v27 = vld [vmem:[%s484_s1] ss:$0 sm:$0xff]  ;;  %v350_v58 = vld [vmem:[%s487_s7 + $0x8] sm:$0xff]   ;;  %v351_v59 = vld [vmem:[%s487_s7 + $0x10] sm:$0xff]  }
   0x4   :  { %323 = vmatprep.subr.bf16.mxu0 %v360_v15  ;;  %v298_v31 = vld [vmem:[%s485_s2] ss:$0 sm:$0xff] }
   0x5   :  { %v299_v36 = vld [vmem:[%s486_s4] ss:$0 sm:$0xff] }
   0x6   :  { %v349_v57 = vld [vmem:[%s487_s7] sm:$0xff]  }
   0x7   :  { %40 = vadd.xlane.f32.xlu0 %v39_v3  ;;  %324 = vmatpush3.bf16.msra.mxu0 %v346_v16  ;;  %v305_v3 = vld [vmem:[%s488_s5] ss:$0 sm:$0xff] }
   0x8   :  { %325 = vmatprep.subr.bf16.mxu0 %v360_v15  ;;  %334 = vmatpush3.bf16.msra.mxu1 %v349_v57 }
   0x9   :  { %335 = vmatprep.subr.bf16.mxu1 %v360_v15 }
   0xb   :  { %326 = vmatpush3.bf16.msra.mxu0 %v347_v17 }
   0xc   :  { %327 = vmatprep.subr.bf16.mxu0 %v360_v15  ;;  %336 = vmatpush3.bf16.msra.mxu1 %v350_v58 }
   0xd   :  { %337 = vmatprep.subr.bf16.mxu1 %v360_v15 }
   0xf   :  { %328 = vmatpush3.bf16.msra.mxu0 %v348_v18 }
  0x10   :  { %338 = vmatpush3.bf16.msra.mxu1 %v351_v59 }
  0x90   :  { %v38_v4 = vpop.xlane.xlu0 %37 }
  0x91   :  { %v43_v5 = vmul.f32 0.015625, %v38_v4 }
  0x93   :  { %v45_v6 = vsub.f32 %v33_v0, %v43_v5 }
  0x94   :  { %v41_v7 = vpop.xlane.xlu0 %40 }
  0x95   :  { %v44_v8 = vmul.f32 0.015625, %v41_v7  ;;  %v47_v9 = vmul.f32 %v45_v6, %v45_v6 }
  0x97   :  { %v46_v10 = vsub.f32 %v34_v1, %v44_v8  ;;  %v49_v11 = vsel %vm35_vm0, %v47_v9, 0.0  ;;  %v306_v8 = vld [vmem:[%s489_s6] ss:$0 sm:$0xff] }
  0x98   :  { %50 = vadd.xlane.f32.xlu1 %v49_v11 }
  0x99   :  { %v48_v12 = vmul.f32 %v46_v10, %v46_v10 }
  0x9b   :  { %v52_v13 = vsel %vm35_vm0, %v48_v12, 0.0 }
  0x9c   :  { %53 = vadd.xlane.f32.xlu1 %v52_v13  ;;  %v307_v13 = vld [vmem:[%s490_s8] ss:$0 sm:$0xff] }
 0x125   :  { %v51_v19 = vpop.xlane.xlu1 %50 }
 0x126   :  { %v55_v20 = vmul.f32 0.015625, %v51_v19 }
 0x128   :  { %v57_v21 = vadd.f32 1e-05, %v55_v20 }
 0x129   :  { %v54_v22 = vpop.xlane.xlu1 %53 }
 0x12a   :  { %352 = vrsqrt.f32 %v57_v21  ;;  %v56_v23 = vmul.f32 0.015625, %v54_v22 }
 0x12c   :  { %v58_v24 = vadd.f32 1e-05, %v56_v23 }
 0x12e   :  { %354 = vrsqrt.f32 %v58_v24 }
 0x134   :  { %v353_v25 = vpop.eup %352 }
 0x135   :  { %v61_v26 = vmul.f32 %v353_v25, %v45_v6 }
 0x137   :  { %v70_v30 = vmul.f32 %v297_v27, %v61_v26 }
 0x138   :  { %v355_v28 = vpop.eup %354 }
 0x139   :  { %v62_v29 = vmul.f32 %v355_v28, %v46_v10  ;;  %v79_v33 = vadd.f32 %v298_v31, %v70_v30 }
 0x13b   :  { %v71_v32 = vmul.f32 %v297_v27, %v62_v29 }
 0x13d   :  { %v80_v34 = vadd.f32 %v298_v31, %v71_v32 }
 0x13f   :  { %v81_v35 = vpack.c.bf16 %v80_v34, %v79_v33 }
 0x141   :  { %330 = vmatmul.mubr.msk.bf16.vlgmr.msra.gmra.mrb[0].mxu0 %vm35_vm0, %v81_v35 }
 0x214   :  { %v158_v37 = vpop.f32.mrb[0].mxu0 }
 0x215   :  { %v159_v38 = vadd.f32 %v299_v36, %v158_v37  ;;  %v331_v39 = vpop.f32.mrb[1].mxu0 }
 0x216   :  { %v161_v40 = vpop.f32.mrb[2].mxu0 }
 0x217   :  { %v165_v41 = vmax.f32 %v159_v38, 0.0  ;;  %v162_v42 = vadd.f32 %v299_v36, %v161_v40  ;;  %v332_v43 = vpop.f32.mrb[3].mxu0 }
 0x219   :  { %v166_v44 = vmax.f32 %v162_v42, 0.0  ;;  %v168_v45 = vsel %vm167_vm2, %v165_v41, 0.0 }
 0x21a   :  { %169 = vadd.xlane.f32.xlu0 %v168_v45 }
 0x21b   :  { %v171_v46 = vsel %vm167_vm2, %v166_v44, 0.0 }
 0x21c   :  { %172 = vadd.xlane.f32.xlu1 %v171_v46 }
 0x2a7   :  { %v170_v47 = vpop.xlane.xlu0 %169 }
 0x2a8   :  { %v175_v48 = vmul.f32 0.020833334, %v170_v47 }
 0x2a9   :  { %v173_v49 = vpop.xlane.xlu1 %172 }
 0x2aa   :  { %v177_v50 = vsub.f32 %v165_v41, %v175_v48  ;;  %v176_v51 = vmul.f32 0.020833334, %v173_v49 }
 0x2ac   :  { %v178_v52 = vsub.f32 %v166_v44, %v176_v51  ;;  %v179_v53 = vmul.f32 %v177_v50, %v177_v50 }
 0x2ae   :  { %v181_v54 = vsel %vm167_vm2, %v179_v53, 0.0  ;;  %v180_v55 = vmul.f32 %v178_v52, %v178_v52 }
 0x2af   :  { %182 = vadd.xlane.f32.xlu0 %v181_v54 }
 0x2b0   :  { %v184_v56 = vsel %vm167_vm2, %v180_v55, 0.0 }
 0x2b1   :  { %185 = vadd.xlane.f32.xlu1 %v184_v56 }
 0x33c   :  { %v183_v60 = vpop.xlane.xlu0 %182 }
 0x33d   :  { %v187_v61 = vmul.f32 0.020833334, %v183_v60 }
 0x33e   :  { %v186_v62 = vpop.xlane.xlu1 %185 }
 0x33f   :  { %v189_v63 = vadd.f32 1e-05, %v187_v61  ;;  %v188_v0 = vmul.f32 0.020833334, %v186_v62 }
 0x341   :  { %356 = vrsqrt.f32 %v189_v63  ;;  %v190_v1 = vadd.f32 1e-05, %v188_v0 }
 0x343   :  { %358 = vrsqrt.f32 %v190_v1 }
 0x34b   :  { %v357_v2 = vpop.eup %356 }
 0x34c   :  { %v193_v4 = vmul.f32 %v357_v2, %v177_v50 }
 0x34d   :  { %v359_v5 = vpop.eup %358 }
 0x34e   :  { %v194_v6 = vmul.f32 %v359_v5, %v178_v52  ;;  %v202_v7 = vmul.f32 %v305_v3, %v193_v4 }
 0x350   :  { %v203_v9 = vmul.f32 %v305_v3, %v194_v6  ;;  %v211_v10 = vadd.f32 %v306_v8, %v202_v7 }
 0x352   :  { %v212_v11 = vadd.f32 %v306_v8, %v203_v9 }
 0x354   :  { %v213_v12 = vpack.c.bf16 %v212_v11, %v211_v10 }
 0x356   :  { %340 = vmatmul.mubr.msk.bf16.vlgmr.msra.gmra.mrb[0].mxu1 %vm167_vm2, %v213_v12 }
 0x429   :  { %v282_v14 = vpop.f32.mrb[0].mxu1 }
 0x42a   :  { %v283_v15 = vadd.f32 %v307_v13, %v282_v14  ;;  %v341_v16 = vpop.f32.mrb[1].mxu1 }
 0x42b   :  { %v285_v17 = vpop.f32.mrb[2].mxu1 }
 0x42c   :  { %v289_v18 = vmax.f32 %v283_v15, 0.0  ;;  %v286_v19 = vadd.f32 %v307_v13, %v285_v17  ;;  %v342_v20 = vpop.f32.mrb[3].mxu1 }
 0x42e   :  { %291 = vst [vmem:[%s491_s9] sm:$0xff] %v289_v18  ;;  %v290_v21 = vmax.f32 %v286_v19, 0.0 }
 0x430   :  { %292 = vst [vmem:[%s491_s9 + $0x8] sm:$0xff] %v290_v21 }

</bundles_post_ra>
